<compile_context>
chip_gen: v7x
topology: tpu7x:2x2x1
jax: 0.10.0
libtpu: 0.0.40
codegen_flags: <defaults>
</compile_context>

<pallas_src>
import functools

import jax
import jax.numpy as jnp
from jax.experimental import pallas as pl
from jax.experimental.pallas import tpu as pltpu


# -----------------------------------------------------------------------------
# Kernel bodies
# -----------------------------------------------------------------------------
def _per_row_loss(x_ref, t_ref, *, on_val: float, off_val: float):
    """Per-row smoothed-CE loss for one (TN, C) logits tile. Returns (TN, 1) f32.

    loss[n] = (m + lse) * Q - sum_c w[n,c] * x[n,c]
      w[n,c] = off + (on - off) * 1{c == t[n]},   Q = on + (C-1)*off,
      m = max_c x[n,:],  lse = log sum_c exp(x[n,:] - m)
    Never materializes logprobs or the smoothed one-hot. x_ref is re-read per
    reduction so the f32 upcast fuses into each reduce instead of producing a
    single large shared f32 temp held live across all reductions.
    """
    tn, c = x_ref.shape
    t = t_ref[...].reshape(tn, 1)                                      # (1,TN) -> (TN,1)

    m = jnp.max(x_ref[...], axis=1, keepdims=True).astype(jnp.float32)  # exact in bf16
    sum_exp = jnp.sum(jnp.exp(x_ref[...].astype(jnp.float32) - m),
                      axis=1, keepdims=True)
    lse = jnp.log(sum_exp)

    classes = jax.lax.broadcasted_iota(jnp.int32, (tn, c), 1)
    # Fused weighted reduce replaces separate sum_x and x_t reductions.
    w = jnp.where(classes == t, jnp.float32(on_val), jnp.float32(off_val))
    row = jnp.sum(w * x_ref[...].astype(jnp.float32), axis=1, keepdims=True)

    q_sum = jnp.float32(on_val + (c - 1) * off_val)
    return (m + lse) * q_sum - row                                     # (TN, 1) f32


def _smooth_ce_partial_kernel(x_ref, t_ref, o_ref, *, on_val: float, off_val: float,
                              n_rows: int, tile_rows: int):
    """Per-tile partial sum of per-row losses; lane-dense (1, 128) output slab.

    Ragged last tile: rows with global index >= n_rows are read from padded
    (uninitialized) logits, so they are explicitly masked to contribute 0.
    """
    per_row = _per_row_loss(x_ref, t_ref, on_val=on_val, off_val=off_val)  # (TN, 1)
    tn = per_row.shape[0]
    base = pl.program_id(0) * tile_rows
    rows = jax.lax.broadcasted_iota(jnp.int32, (tn, 1), 0) + base
    masked = jnp.where(rows < n_rows, per_row, 0.0)
    partial = jnp.sum(masked, axis=0, keepdims=True)                       # (1, 1)
    o_ref[...] = jnp.broadcast_to(partial, (1, 128)).astype(jnp.float32)


def _smooth_ce_rows_kernel(x_ref, t_ref, o_ref, *, on_val: float, off_val: float):
    """Per-sample losses, stored lane-dense as a (1, TN) slab (cheap relayout)."""
    per_row = _per_row_loss(x_ref, t_ref, on_val=on_val, off_val=off_val)  # (TN, 1)
    tn = per_row.shape[0]
    o_ref[...] = per_row.reshape(1, tn)


# -----------------------------------------------------------------------------
# Tiling / wrapper
# -----------------------------------------------------------------------------
def _vmem_limit_bytes() -> int:
    """Generation-aware scoped-VMEM limit (safe on v5e/v6e/v7x)."""
    cap = 64 << 20
    try:
        info = pltpu.get_tpu_info()
        cap = int(getattr(info, "vmem_capacity_bytes", cap))
    except Exception:
        pass
    # 3/4 of reported capacity, capped at 64 MiB so the same limit is always
    # safe against v7x's 64 MiB-per-TensorCore VMEM.
    return int(min(cap * 3 // 4, 64 << 20))


def _round8_down(x: int) -> int:
    return max(8, (x // 8) * 8)


def _pick_batch_tile(n: int, c: int, itemsize: int, vmem_limit: int) -> int:
    """Size TN from the VMEM byte budget (no small hard cap).

    Budget model per row: 2x double-buffered input (c*itemsize each) plus ~3
    f32 working arrays of width max(c, 128) (the (TN,C) f32 elementwise temps
    and the lane-padded (TN,1) per-row temps). TN is capped at 4096 rows so
    lane-padded (TN,1) temporaries stay <= ~2 MiB each, and >=2 grid steps are
    guaranteed whenever N >= 16 so both v7x TensorCores get work.
    """
    if n <= 8:
        return n                                  # block equals full batch dim -> legal
    usable = int(vmem_limit * 0.6)                # leave headroom for double-buffering etc.
    row_bytes = 2 * c * itemsize + 3 * max(c, 128) * 4
    tn = max(8, usable // row_bytes)
    tn = min(tn, 4096, n)
    if n >= 16:
        tn = min(tn, _round8_down(-(-n // 2)))    # guarantee >= 2 grid steps
    return _round8_down(tn)


def smooth_ce_loss(logits: jax.Array, target: jax.Array, *, delta: float,
                   num_classes: int, reduction: str = "mean") -> jax.Array:
    """Pallas label-smoothing CE. logits: (N, C), target: (N,) int. Mean by default."""
    n, c = logits.shape
    assert c == num_classes and num_classes >= 2
    assert reduction in ("mean", "sum", "none")

    # Exactly match torch.clamp(one_hot.float(), min=delta/(C-1), max=1-delta):
    off_raw = delta / (num_classes - 1)
    on_raw = 1.0 - delta
    on_val = min(max(1.0, off_raw), on_raw)       # clamp(1, min=off_raw, max=on_raw)
    off_val = min(max(0.0, off_raw), on_raw)      # clamp(0, min=off_raw, max=on_raw)

    vmem_limit = _vmem_limit_bytes()
    tn = _pick_batch_tile(n, c, jnp.dtype(logits.dtype).itemsize, vmem_limit)
    num_tiles = pl.cdiv(n, tn)

    # Lane-dense targets: pad to num_tiles*tn and reshape to (num_tiles, tn) so
    # each grid step loads a contiguous (1, TN) int32 slab (no strided DMA).
    t_flat = target.astype(jnp.int32)
    pad = num_tiles * tn - n
    if pad:
        t_flat = jnp.pad(t_flat, (0, pad))
    t2d = t_flat.reshape(num_tiles, tn)

    in_specs = [
        pl.BlockSpec((tn, c), lambda i: (i, 0)),   # streamed logits tile
        pl.BlockSpec((1, tn), lambda i: (i, 0)),   # lane-dense target tile
    ]
    compiler_params = pltpu.CompilerParams(
        dimension_semantics=("parallel",),         # batch axis: both TCs on v7x
        vmem_limit_bytes=vmem_limit,
    )

    if reduction in ("mean", "sum"):
        kernel = functools.partial(_smooth_ce_partial_kernel, on_val=on_val,
                                   off_val=off_val, n_rows=n, tile_rows=tn)
        partials = pl.pallas_call(
            kernel,
            out_shape=jax.ShapeDtypeStruct((num_tiles, 128), jnp.float32),
            grid_spec=pltpu.PrefetchScalarGridSpec(
                num_scalar_prefetch=0,
                grid=(num_tiles,),
                in_specs=in_specs,
                out_specs=pl.BlockSpec((1, 128), lambda i: (i, 0)),
            ),
            compiler_params=compiler_params,
        )(logits, t2d)
        total = jnp.sum(partials[:, 0])
        if reduction == "mean":
            return total / jnp.float32(n)          # divide by the GLOBAL N
        return total

    # reduction == 'none': lane-dense per-sample output, trim padding in wrapper.
    kernel = functools.partial(_smooth_ce_rows_kernel, on_val=on_val, off_val=off_val)
    rows = pl.pallas_call(
        kernel,
        out_shape=jax.ShapeDtypeStruct((num_tiles, tn), jnp.float32),
        grid_spec=pltpu.PrefetchScalarGridSpec(
            num_scalar_prefetch=0,
            grid=(num_tiles,),
            in_specs=in_specs,
            out_specs=pl.BlockSpec((1, tn), lambda i: (i, 0)),
        ),
        compiler_params=compiler_params,
    )(logits, t2d)
    return rows.reshape(-1)[:n]


# -----------------------------------------------------------------------------
# Pure-JAX reference (matches the PyTorch forward exactly) + tests
# -----------------------------------------------------------------------------
def _reference_per_sample(logits, target, delta, num_classes):
    logprobs = jax.nn.log_softmax(logits.astype(jnp.float32), axis=1)
    oh = jax.nn.one_hot(target, num_classes, dtype=jnp.float32)
    q = jnp.clip(oh, delta / (num_classes - 1), 1.0 - delta)
    return -jnp.sum(q * logprobs, axis=1)


if __name__ == "__main__":
    # --- test 1: the spec's (minibatch, C) case, small shapes, f32, mean ---
    DELTA, C, N = 0.1, 16, 8
    k1, k2 = jax.random.split(jax.random.PRNGKey(0))
    logits = jax.random.normal(k1, (N, C), dtype=jnp.float32)
    target = jax.random.randint(k2, (N,), 0, C, dtype=jnp.int32)
    loss = jax.block_until_ready(
        smooth_ce_loss(logits, target, delta=DELTA, num_classes=C))
    ref = jnp.mean(_reference_per_sample(logits, target, DELTA, C))
    assert jnp.allclose(loss, ref, atol=1e-5, rtol=1e-5), (loss, ref)

    # --- test 2: ragged batch tiling + bf16 input, mean and 'none' paths ---
    DELTA2, C2, N2 = 0.2, 24, 20
    k3, k4 = jax.random.split(jax.random.PRNGKey(1))
    logits2 = jax.random.normal(k3, (N2, C2), dtype=jnp.float32).astype(jnp.bfloat16)
    target2 = jax.random.randint(k4, (N2,), 0, C2, dtype=jnp.int32)
    loss2 = jax.block_until_ready(
        smooth_ce_loss(logits2, target2, delta=DELTA2, num_classes=C2))
    ref2_rows = _reference_per_sample(logits2, target2, DELTA2, C2)
    assert jnp.allclose(loss2, jnp.mean(ref2_rows), atol=1e-4, rtol=1e-4), (loss2,)
    rows2 = jax.block_until_ready(
        smooth_ce_loss(logits2, target2, delta=DELTA2, num_classes=C2, reduction="none"))
    assert rows2.shape == (N2,)
    assert jnp.allclose(rows2, ref2_rows, atol=2e-4, rtol=2e-4), (rows2, ref2_rows)

    # --- test 3: multi-tile grid with ragged, masked last tile (partial sums) ---
    DELTA3, C3, N3 = 0.05, 130, 300
    k5, k6 = jax.random.split(jax.random.PRNGKey(2))
    logits3 = jax.random.normal(k5, (N3, C3), dtype=jnp.float32)
    target3 = jax.random.randint(k6, (N3,), 0, C3, dtype=jnp.int32)
    loss3 = jax.block_until_ready(
        smooth_ce_loss(logits3, target3, delta=DELTA3, num_classes=C3))
    ref3 = jnp.mean(_reference_per_sample(logits3, target3, DELTA3, C3))
    assert jnp.allclose(loss3, ref3, atol=1e-4, rtol=1e-4), (loss3, ref3)

    # TODO(synk): the K-dimensional (N, C, d1..dK) case and ignore_index are not
    # exercised by this module's forward() and are not implemented here.

    print("KERNEL_OK")
</pallas_src>

<mosaic_0001>
module attributes {stable_mosaic.version = 11 : i64} {
  func.func @_smooth_ce_partial_kernel(%arg0: i32, %arg1: memref<8x16xf32, #tpu.memory_space<vmem>>, %arg2: memref<1x8xi32, #tpu.memory_space<vmem>>, %arg3: memref<1x128xf32, #tpu.memory_space<vmem>>) attributes {dimension_semantics = [#tpu.dimension_semantics<parallel>], iteration_bounds = array<i64: 1>, scalar_prefetch = 0 : i64, scratch_operands = 0 : i64, tpu.core_type = #tpu.core_type<tc>, window_params = [{transform_indices = @transform_0, window_bounds = array<i64: 8, 16>}, {transform_indices = @transform_1, window_bounds = array<i64: 1, 8>}, {transform_indices = @transform_2, window_bounds = array<i64: 1, 128>}]} {
    %c0 = arith.constant 0 : index
    %c0_0 = arith.constant 0 : index
    %0 = vector.load %arg2[%c0, %c0_0] : memref<1x8xi32, #tpu.memory_space<vmem>>, vector<1x8xi32>
    %1 = vector.shape_cast %0 : vector<1x8xi32> to vector<8x1xi32>
    %c0_1 = arith.constant 0 : index
    %c0_2 = arith.constant 0 : index
    %2 = vector.load %arg1[%c0_1, %c0_2] : memref<8x16xf32, #tpu.memory_space<vmem>>, vector<8x16xf32>
    %cst = arith.constant dense<0xFF800000> : vector<8xf32>
    %3 = vector.multi_reduction <maximumf>, %2, %cst [1] : vector<8x16xf32> to vector<8xf32>
    %4 = vector.shape_cast %3 : vector<8xf32> to vector<8x1xf32>
    %c0_3 = arith.constant 0 : index
    %c0_4 = arith.constant 0 : index
    %5 = vector.load %arg1[%c0_3, %c0_4] : memref<8x16xf32, #tpu.memory_space<vmem>>, vector<8x16xf32>
    %6 = vector.broadcast %4 : vector<8x1xf32> to vector<8x16xf32>
    %7 = arith.subf %5, %6 : vector<8x16xf32>
    %8 = math.exp %7 : vector<8x16xf32>
    %cst_5 = arith.constant dense<0.000000e+00> : vector<8xf32>
    %9 = vector.multi_reduction <add>, %8, %cst_5 [1] : vector<8x16xf32> to vector<8xf32>
    %10 = vector.shape_cast %9 : vector<8xf32> to vector<8x1xf32>
    %11 = math.log %10 : vector<8x1xf32>
    %12 = tpu.iota {dimensions = array<i32: 1>} : vector<8x16xi32>
    %13 = vector.broadcast %1 : vector<8x1xi32> to vector<8x16xi32>
    %14 = arith.cmpi eq, %12, %13 : vector<8x16xi32>
    %cst_6 = arith.constant 0.899999976 : f32
    %cst_7 = arith.constant 0.00666666683 : f32
    %15 = vector.broadcast %cst_6 : f32 to vector<8x16xf32>
    %16 = vector.broadcast %cst_7 : f32 to vector<8x16xf32>
    %17 = arith.select %14, %15, %16 : vector<8x16xi1>, vector<8x16xf32>
    %c0_8 = arith.constant 0 : index
    %c0_9 = arith.constant 0 : index
    %18 = vector.load %arg1[%c0_8, %c0_9] : memref<8x16xf32, #tpu.memory_space<vmem>>, vector<8x16xf32>
    %19 = arith.mulf %17, %18 : vector<8x16xf32>
    %cst_10 = arith.constant dense<0.000000e+00> : vector<8xf32>
    %20 = vector.multi_reduction <add>, %19, %cst_10 [1] : vector<8x16xf32> to vector<8xf32>
    %21 = vector.shape_cast %20 : vector<8xf32> to vector<8x1xf32>
    %22 = arith.addf %4, %11 : vector<8x1xf32>
    %cst_11 = arith.constant 1.000000e+00 : f32
    %23 = vector.broadcast %cst_11 : f32 to vector<8x1xf32>
    %24 = arith.mulf %22, %23 : vector<8x1xf32>
    %25 = arith.subf %24, %21 : vector<8x1xf32>
    %c8_i32 = arith.constant 8 : i32
    %26 = arith.muli %arg0, %c8_i32 : i32
    %27 = tpu.iota {dimensions = array<i32: 0>} : vector<8x1xi32>
    %28 = vector.broadcast %26 : i32 to vector<8x1xi32>
    %29 = arith.addi %27, %28 : vector<8x1xi32>
    %c8_i32_12 = arith.constant 8 : i32
    %30 = vector.broadcast %c8_i32_12 : i32 to vector<8x1xi32>
    %31 = arith.cmpi slt, %29, %30 : vector<8x1xi32>
    %cst_13 = arith.constant 0.000000e+00 : f32
    %32 = vector.broadcast %cst_13 : f32 to vector<8x1xf32>
    %33 = arith.select %31, %25, %32 : vector<8x1xi1>, vector<8x1xf32>
    %cst_14 = arith.constant dense<0.000000e+00> : vector<1xf32>
    %34 = vector.multi_reduction <add>, %33, %cst_14 [0] : vector<8x1xf32> to vector<1xf32>
    %35 = vector.shape_cast %34 : vector<1xf32> to vector<1x1xf32>
    %36 = vector.shape_cast %35 : vector<1x1xf32> to vector<1x1xf32>
    %37 = vector.broadcast %36 : vector<1x1xf32> to vector<1x128xf32>
    %c0_15 = arith.constant 0 : index
    %c0_16 = arith.constant 0 : index
    %38 = vector.load %arg3[%c0_15, %c0_16] : memref<1x128xf32, #tpu.memory_space<vmem>>, vector<1x128xf32>
    tpu.vector_store %arg3[%c0_15, %c0_16], %37 {strides = array<i32>} : memref<1x128xf32, #tpu.memory_space<vmem>>, vector<1x128xf32>,
    return
  }
  func.func @transform_0(%arg0: i32) -> (i32, i32) {
    %c0_i32 = arith.constant 0 : i32
    %c0_i32_0 = arith.constant 0 : i32
    return %arg0, %c0_i32 : i32, i32
  }
  func.func @transform_1(%arg0: i32) -> (i32, i32) {
    %c0_i32 = arith.constant 0 : i32
    %c0_i32_0 = arith.constant 0 : i32
    return %arg0, %c0_i32 : i32, i32
  }
  func.func @transform_2(%arg0: i32) -> (i32, i32) {
    %c0_i32 = arith.constant 0 : i32
    %c0_i32_0 = arith.constant 0 : i32
    return %arg0, %c0_i32 : i32, i32
  }
}

</mosaic_0001>

<bundles_post_ra>
// kernel: tpu_custom_call.1
= control target key start
LH: loop header
LB: loop body
LE: loop exit
PB: predicated region body
PF: predicated region fallthrough
CT: control target
= control target key end

     0   :  { %7 = vsyncpa [#allocation3], 0  ;;  %s188_s0 = inlined_call_operand.hbm [shape: f32[8,16], index: 0, kind: input, shape index: {}]   ;;  %s189_s1 = inlined_call_operand.vmem [shape: s32[1,8], index: 1, kind: input, shape index: {}]   ;;  %s190_s2 = inlined_call_operand.hbm [shape: f32[1,128], index: 2, kind: output, shape index: {}]  }
   0x1   :  { %8 = vsyncpa [#allocation4], 0  ;;  %s140_s9 = smov [#allocation2]   ;;  %s92_s13 = scalar_lea.hbm %s188_s0, 128 }
   0x2   :  { %s15_s10 = sshll.u32 %s140_s9, 4  ;;  %p93_p0 = scmp.ne.s32.totalorder %s188_s0, %s92_s13  ;;  %s16_s10 = int_to_ptr.vmem [resolvable:$true] %s15_s10 }
   0x3   :  { %p96_p1 = scmp.lt.u32.totalorder %s92_s13, %s188_s0 }
   0x5   :  { %p98_p2 = pnand %p96_p1, %p93_p0 }
   0x7   :  { %101 = shalt.err (!%p98_p2)
}
   0x8   :  { %s102_s18 = scalar_lea.vmem %s16_s10, 128  ;;  %p107_p4 = scmp.lt.s32.totalorder %s16_s10, %s16_s10 }
   0x9   :  { %p103_p3 = scmp.ne.s32.totalorder %s16_s10, %s102_s18  ;;  %p108_p5 = scmp.lt.s32.totalorder %s102_s18, %s102_s18 }
   0xb   :  { %p109_p6 = por %p108_p5, %p107_p4 }
   0xd   :  { %p110_p7 = pnand %p109_p6, %p103_p3 }
   0xf   :  { %113 = shalt.err (!%p110_p7)
}
  0x10   :  { %18 = dma.hbm_to_vmem [thread:$0]  %s188_s0, 128, %s16_s10, [#allocation3]  }
  0x11   :  { %136 = dma.done.wait [#allocation3], 128  }
  0x12   :  { %137 = vsyncadd [#allocation3], 4294967168  ;;  %vm33_vm0 = vcmask 130048   ;;  %v32_v0 = vld [vmem:[#allocation2] sm:$0xff]  ;;  %v45_v4 = vlaneseq  ;;  %v141_v9 = vmov 0.006666667  }
  0x13   :  { %v34_v1 = vsel %vm33_vm0, %v32_v0, -inf  ;;  %v84_v2 = vld [vmem:[%s189_s1] ss:$0 sm:$0xff]  ;;  %s142_s0 = smov [#allocation5]  }
  0x14   :  { %35 = vmax.xlane.f32.xlu0 %v34_v1  ;;  %v46_v7 = vand.u32 127, %v45_v4  ;;  %s75_s1 = sshll.u32 %s142_s0, 4  ;;  %s76_s1 = int_to_ptr.vmem [resolvable:$true] %s75_s1 }
  0x15   :  { %s114_s23 = scalar_lea.vmem %s76_s1, 16  ;;  %s118_s24 = scalar_lea.vmem %s76_s1, 32 }
  0x16   :  { %p115_p8 = scmp.ne.s32.totalorder %s76_s1, %s114_s23  ;;  %p119_p9 = scmp.lt.s32.totalorder %s76_s1, %s76_s1 }
  0x17   :  { %p120_p10 = scmp.lt.s32.totalorder %s118_s24, %s114_s23 }
  0x19   :  { %p121_p11 = por %p120_p10, %p119_p9 }
  0x1b   :  { %p122_p12 = pnand %p121_p11, %p115_p8 }
  0x2a   :  { %30 = vbcast.lane.b32.xlu0 %v84_v2, 256 }
  0xa1   :  { %v36_v3 = vpop.xlane.xlu0 %35 }
  0xa2   :  { %v37_v5 = vsub.f32 %v32_v0, %v36_v3 }
  0xa4   :  { %v38_v6 = vmul.f32 1.442695, %v37_v5 }
  0xa5   :  { %v31_v8 = vpop.permute.xlu0 %30 }
  0xa6   :  { %88 = vpow2.f32 %v38_v6  ;;  %vm47_vm1 = vcmp.eq.s32.totalorder %v46_v7, %v31_v8 }
  0xa7   :  { %v48_v10 = vsel %vm47_vm1, 0.9, %v141_v9 }
  0xa8   :  { %v49_v11 = vmul.f32 %v48_v10, %v32_v0 }
  0xaa   :  { %v50_v14 = vsel %vm33_vm0, %v49_v11, 0.0 }
  0xb0   :  { %v89_v12 = vpop.eup %88 }
  0xb1   :  { %v40_v13 = vsel %vm33_vm0, %v89_v12, 0.0 }
  0xb2   :  { %41 = vadd.xlane.f32.xlu1 %v40_v13 }
  0xb6   :  { %51 = vadd.xlane.f32.xlu1 %v50_v14 }
 0x13f   :  { %v42_v15 = vpop.xlane.xlu1 %41 }
 0x140   :  { %90 = vlog2.f32 %v42_v15 }
 0x143   :  { %v52_v18 = vpop.xlane.xlu1 %51 }
 0x14a   :  { %v91_v16 = vpop.eup %90 }
 0x14b   :  { %v44_v17 = vmul.f32 0.6931472, %v91_v16 }
 0x14d   :  { %v53_v19 = vadd.f32 %v44_v17, %v36_v3 }
 0x14f   :  { %v54_v20 = vsub.f32 %v53_v19, %v52_v18 }
 0x151   :  { %v62_v21 = vrot.slane %v54_v20, 4 }
 0x153   :  { %v63_v22 = vadd.f32 %v62_v21, %v54_v20 }
 0x155   :  { %v64_v23 = vrot.slane %v63_v22, 2 }
 0x157   :  { %v65_v24 = vadd.f32 %v64_v23, %v63_v22 }
 0x159   :  { %v66_v25 = vrot.slane %v65_v24, 1 }
 0x15b   :  { %v67_v26 = vadd.f32 %v66_v25, %v65_v24 }
 0x15d   :  { %68 = vst [vmem:[#allocation5] sm:$0x1] %v67_v26 }
 0x15e   :  { %125 = shalt.err (!%p122_p12)
}
 0x15f   :  { %s126_s27 = scalar_lea.hbm %s190_s2, 16 }
 0x160   :  { %p127_p13 = scmp.ne.s32.totalorder %s190_s2, %s126_s27  ;;  %p130_p0 = scmp.lt.u32.totalorder %s126_s27, %s190_s2 }
 0x162   :  { %p132_p1 = pnand %p130_p0, %p127_p13 }
 0x164   :  { %135 = shalt.err (!%p132_p1)
}
 0x165   :  { %78 = dma.vmem_to_hbm [thread:$0]  %s76_s1, 16, %s190_s2, [#allocation4]  }
 0x166   :  { %138 = dma.done.wait [#allocation4], 16  }
 0x167   :  { %139 = vsyncadd [#allocation4], 4294967280 }
 0x168   :  { %82 = vsyncpa [#allocation3], 1 }
 0x169   :  { %83 = vsyncpa [#allocation4], 1 }

</bundles_post_ra>
